<compile_context>
chip_gen: v5e
topology: v5e:2x2
jax: 0.10.0
libtpu: 0.0.40
codegen_flags: <defaults>
</compile_context>

<pallas_src>
import functools

import jax
import jax.numpy as jnp
from jax import lax
from jax.experimental import pallas as pl
from jax.experimental.pallas import tpu as pltpu


# ---------------------------------------------------------------------------
# Kernel
# ---------------------------------------------------------------------------
def _mha_kernel(q_ref, k_ref, v_ref,
                wq_ref, bq_ref, wk_ref, bk_ref, wv_ref, bv_ref,
                wo_ref, bo_ref,
                o_ref,
                qp_s, kp_s, vp_s, acc_s,
                *, matmul_dtype):
    """One (batch, head) grid step of the fused multi-head attention."""
    hd = pl.program_id(1)
    n_heads = pl.num_programs(1)

    # Head 0 starts from the original activations; later heads project the
    # previous head's projections, carried in VMEM scratch (never via HBM).
    @pl.when(hd == 0)
    def _():
        qp_s[...] = q_ref[...]
        kp_s[...] = k_ref[...]
        vp_s[...] = v_ref[...]
        acc_s[...] = jnp.zeros_like(acc_s)

    # Per-head linear projections (kept in f32 — they are the carried chain).
    qp = jnp.dot(qp_s[...], wq_ref[...], preferred_element_type=jnp.float32) + bq_ref[...]
    kp = jnp.dot(kp_s[...], wk_ref[...], preferred_element_type=jnp.float32) + bk_ref[...]
    vp = jnp.dot(vp_s[...], wv_ref[...], preferred_element_type=jnp.float32) + bv_ref[...]

    # Carry the (unscaled) projections to the next head.
    qp_s[...] = qp
    kp_s[...] = kp
    vp_s[...] = vp

    # Scaled dot-product attention.  Fold 1/sqrt(d_k) into q (fewer elements
    # than scaling the [Lq, L] scores) and fold the k-transpose into the
    # dot_general contraction instead of materializing kp.T through the XLU.
    d_k = qp.shape[-1]
    q_scaled = qp * (1.0 / jnp.sqrt(jnp.float32(d_k)))
    scores = lax.dot_general(
        q_scaled.astype(matmul_dtype), kp.astype(matmul_dtype),
        dimension_numbers=(((1,), (1,)), ((), ())),
        preferred_element_type=jnp.float32)

    # Softmax in f32; normalization via EUP reciprocal (free slot next to exp).
    m = jnp.max(scores, axis=-1, keepdims=True)
    e = jnp.exp(scores - m)
    attn = e * pl.reciprocal(jnp.sum(e, axis=-1, keepdims=True), approx=True)
    # TODO(synk): dropout on `attn` omitted (identity in eval-mode forward).

    ctx = jnp.dot(attn.astype(matmul_dtype), vp.astype(matmul_dtype),
                  preferred_element_type=jnp.float32)

    # Fused output projection: concat(ctx_i) @ Wo == sum_i ctx_i @ Wo_i,
    # accumulated across the head grid axis in f32 VMEM scratch.
    acc_s[...] += jnp.dot(ctx.astype(matmul_dtype),
                          wo_ref[...].astype(matmul_dtype),
                          preferred_element_type=jnp.float32)

    @pl.when(hd == n_heads - 1)
    def _():
        o_ref[...] = acc_s[...] + bo_ref[...]


# ---------------------------------------------------------------------------
# Wrapper
# ---------------------------------------------------------------------------
def multi_head_attention(v, k, q, params, mask=None, *, matmul_dtype=jnp.float32):
    """Pallas implementation of MultiHeadAttention.forward(v, k, q).

    `matmul_dtype=jnp.bfloat16` is the right choice on v6e/v7x at MXU-sized
    shapes (softmax and accumulation stay in f32); f32 default keeps tight
    numerics at these tiny test shapes.
    """
    assert mask is None  # TODO(synk): mask path not exercised (default mask=None)

    wq, bq = params["wq"], params["bq"]          # [h, dk, dk], [h, 1, dk]
    wk, bk = params["wk"], params["bk"]          # [h, dk, dk], [h, 1, dk]
    wv, bv = params["wv"], params["bv"]          # [h, dv, dv], [h, 1, dv]
    wo, bo = params["wo"], params["bo"]          # [h*dv, dv], [1, dv]

    h, dk, _ = wq.shape
    dv = wv.shape[-1]
    B, Lq, _ = q.shape
    _, L, _ = k.shape
    wo_h = wo.reshape(h, dv, dv)                 # per-head slice of output proj

    per_batch = lambda shape: pl.BlockSpec((None,) + shape, lambda b, hd: (b, 0, 0))
    per_head = lambda shape: pl.BlockSpec((None,) + shape, lambda b, hd: (hd, 0, 0))
    shared = lambda shape: pl.BlockSpec(shape, lambda b, hd: (0, 0))

    grid_spec = pltpu.PrefetchScalarGridSpec(
        num_scalar_prefetch=0,
        grid=(B, h),                             # head innermost: sequential chain
        in_specs=[
            per_batch((Lq, dk)),                 # q
            per_batch((L, dk)),                  # k
            per_batch((L, dv)),                  # v
            per_head((dk, dk)), per_head((1, dk)),   # Wq_i, bq_i
            per_head((dk, dk)), per_head((1, dk)),   # Wk_i, bk_i
            per_head((dv, dv)), per_head((1, dv)),   # Wv_i, bv_i
            per_head((dv, dv)),                      # Wo_i (head slice)
            shared((1, dv)),                         # bo
        ],
        out_specs=per_batch((Lq, dv)),
        scratch_shapes=[
            pltpu.VMEM((Lq, dk), jnp.float32),   # carried projected q
            pltpu.VMEM((L, dk), jnp.float32),    # carried projected k
            pltpu.VMEM((L, dv), jnp.float32),    # carried projected v
            pltpu.VMEM((Lq, dv), jnp.float32),   # output-projection accumulator
        ],
    )

    kernel = functools.partial(_mha_kernel, matmul_dtype=matmul_dtype)
    return pl.pallas_call(
        kernel,
        out_shape=jax.ShapeDtypeStruct((B, Lq, dv), jnp.float32),
        grid_spec=grid_spec,
        compiler_params=pltpu.CompilerParams(
            dimension_semantics=("parallel", "arbitrary")),
    )(q, k, v, wq, bq, wk, bk, wv, bv, wo_h, bo)


# ---------------------------------------------------------------------------
# Deterministic parameter init (mimics nn.Linear uniform(-1/sqrt(in), 1/sqrt(in)))
# ---------------------------------------------------------------------------
def init_params(key, dim_k, dim_v, h):
    def lin(k_, din, dout):
        kw, kb = jax.random.split(k_)
        bound = 1.0 / jnp.sqrt(jnp.float32(din))
        w = jax.random.uniform(kw, (din, dout), jnp.float32, -bound, bound)
        b = jax.random.uniform(kb, (1, dout), jnp.float32, -bound, bound)
        return w, b

    keys = jax.random.split(key, 3 * h + 1)
    wq, bq, wk, bk, wv, bv = [], [], [], [], [], []
    for i in range(h):
        w, b = lin(keys[3 * i + 0], dim_k, dim_k); wq.append(w); bq.append(b)
        w, b = lin(keys[3 * i + 1], dim_k, dim_k); wk.append(w); bk.append(b)
        w, b = lin(keys[3 * i + 2], dim_v, dim_v); wv.append(w); bv.append(b)
    wo, bo = lin(keys[-1], h * dim_v, dim_v)
    return {
        "wq": jnp.stack(wq), "bq": jnp.stack(bq),
        "wk": jnp.stack(wk), "bk": jnp.stack(bk),
        "wv": jnp.stack(wv), "bv": jnp.stack(bv),
        "wo": wo, "bo": bo,
    }


# ---------------------------------------------------------------------------
# Pure-JAX reference (mirrors the PyTorch forward, dropout=identity)
# ---------------------------------------------------------------------------
def reference(v, k, q, params):
    h = params["wq"].shape[0]
    ctxs = []
    for i in range(h):
        v = v @ params["wv"][i] + params["bv"][i][0]
        k = k @ params["wk"][i] + params["bk"][i][0]
        q = q @ params["wq"][i] + params["bq"][i][0]
        d_k = q.shape[-1]
        scores = jnp.einsum("bqd,bkd->bqk", q, k) / jnp.sqrt(jnp.float32(d_k))
        attn = jax.nn.softmax(scores, axis=-1)
        ctxs.append(jnp.einsum("bqk,bkd->bqd", attn, v))
    return jnp.concatenate(ctxs, axis=2) @ params["wo"] + params["bo"][0]


if __name__ == "__main__":
    B, L_q, L = 2, 8, 8
    dim_k, dim_v, h = 32, 16, 4

    key = jax.random.PRNGKey(0)
    kq, kk, kv, kp = jax.random.split(key, 4)
    q = jax.random.normal(kq, (B, L_q, dim_k), jnp.float32)
    k = jax.random.normal(kk, (B, L, dim_k), jnp.float32)
    v = jax.random.normal(kv, (B, L, dim_v), jnp.float32)
    params = init_params(kp, dim_k, dim_v, h)

    out = multi_head_attention(v, k, q, params)
    out = jax.block_until_ready(out)

    ref = reference(v, k, q, params)
    assert out.shape == (B, L_q, dim_v), out.shape
    err = float(jnp.max(jnp.abs(out - ref)))
    assert jnp.allclose(out, ref, atol=1e-3, rtol=1e-3), err
    print("KERNEL_OK")
</pallas_src>

<mosaic_0001>
module attributes {stable_mosaic.version = 11 : i64} {
  func.func @_mha_kernel(%arg0: i32, %arg1: i32, %arg2: memref<1x8x32xf32, #tpu.memory_space<vmem>>, %arg3: memref<1x8x32xf32, #tpu.memory_space<vmem>>, %arg4: memref<1x8x16xf32, #tpu.memory_space<vmem>>, %arg5: memref<1x32x32xf32, #tpu.memory_space<vmem>>, %arg6: memref<1x1x32xf32, #tpu.memory_space<vmem>>, %arg7: memref<1x32x32xf32, #tpu.memory_space<vmem>>, %arg8: memref<1x1x32xf32, #tpu.memory_space<vmem>>, %arg9: memref<1x16x16xf32, #tpu.memory_space<vmem>>, %arg10: memref<1x1x16xf32, #tpu.memory_space<vmem>>, %arg11: memref<1x16x16xf32, #tpu.memory_space<vmem>>, %arg12: memref<1x16xf32, #tpu.memory_space<vmem>>, %arg13: memref<1x8x16xf32, #tpu.memory_space<vmem>>, %arg14: memref<8x32xf32, #tpu.memory_space<vmem>>, %arg15: memref<8x32xf32, #tpu.memory_space<vmem>>, %arg16: memref<8x16xf32, #tpu.memory_space<vmem>>, %arg17: memref<8x16xf32, #tpu.memory_space<vmem>>) attributes {dimension_semantics = [#tpu.dimension_semantics<parallel>, #tpu.dimension_semantics<arbitrary>], iteration_bounds = array<i64: 2, 4>, scalar_prefetch = 0 : i64, scratch_operands = 4 : i64, tpu.core_type = #tpu.core_type<tc>, window_params = [{transform_indices = @transform_0, window_bounds = array<i64: 1, 8, 32>}, {transform_indices = @transform_1, window_bounds = array<i64: 1, 8, 32>}, {transform_indices = @transform_2, window_bounds = array<i64: 1, 8, 16>}, {transform_indices = @transform_3, window_bounds = array<i64: 1, 32, 32>}, {transform_indices = @transform_4, window_bounds = array<i64: 1, 1, 32>}, {transform_indices = @transform_5, window_bounds = array<i64: 1, 32, 32>}, {transform_indices = @transform_6, window_bounds = array<i64: 1, 1, 32>}, {transform_indices = @transform_7, window_bounds = array<i64: 1, 16, 16>}, {transform_indices = @transform_8, window_bounds = array<i64: 1, 1, 16>}, {transform_indices = @transform_9, window_bounds = array<i64: 1, 16, 16>}, {pipeline_mode = #tpu.pipeline_mode<synchronous>, transform_indices = @transform_10, window_bounds = array<i64: 1, 16>}, {transform_indices = @transform_11, window_bounds = array<i64: 1, 8, 16>}]} {
    %c0_i32 = arith.constant 0 : i32
    %0 = arith.cmpi eq, %arg1, %c0_i32 : i32
    %1 = arith.extui %0 : i1 to i32
    %c0_i32_0 = arith.constant 0 : i32
    %2 = arith.cmpi ne, %1, %c0_i32_0 : i32
    scf.if %2 {
      %c0_47 = arith.constant 0 : index
      %c0_48 = arith.constant 0 : index
      %c0_49 = arith.constant 0 : index
      %55 = vector.load %arg2[%c0_47, %c0_48, %c0_49] : memref<1x8x32xf32, #tpu.memory_space<vmem>>, vector<1x8x32xf32>
      %56 = vector.shape_cast %55 : vector<1x8x32xf32> to vector<8x32xf32>
      %c0_50 = arith.constant 0 : index
      %c0_51 = arith.constant 0 : index
      %57 = vector.load %arg14[%c0_50, %c0_51] : memref<8x32xf32, #tpu.memory_space<vmem>>, vector<8x32xf32>
      tpu.vector_store %arg14[%c0_50, %c0_51], %56 {strides = array<i32>} : memref<8x32xf32, #tpu.memory_space<vmem>>, vector<8x32xf32>,
      %c0_52 = arith.constant 0 : index
      %c0_53 = arith.constant 0 : index
      %c0_54 = arith.constant 0 : index
      %58 = vector.load %arg3[%c0_52, %c0_53, %c0_54] : memref<1x8x32xf32, #tpu.memory_space<vmem>>, vector<1x8x32xf32>
      %59 = vector.shape_cast %58 : vector<1x8x32xf32> to vector<8x32xf32>
      %c0_55 = arith.constant 0 : index
      %c0_56 = arith.constant 0 : index
      %60 = vector.load %arg15[%c0_55, %c0_56] : memref<8x32xf32, #tpu.memory_space<vmem>>, vector<8x32xf32>
      tpu.vector_store %arg15[%c0_55, %c0_56], %59 {strides = array<i32>} : memref<8x32xf32, #tpu.memory_space<vmem>>, vector<8x32xf32>,
      %c0_57 = arith.constant 0 : index
      %c0_58 = arith.constant 0 : index
      %c0_59 = arith.constant 0 : index
      %61 = vector.load %arg4[%c0_57, %c0_58, %c0_59] : memref<1x8x16xf32, #tpu.memory_space<vmem>>, vector<1x8x16xf32>
      %62 = vector.shape_cast %61 : vector<1x8x16xf32> to vector<8x16xf32>
      %c0_60 = arith.constant 0 : index
      %c0_61 = arith.constant 0 : index
      %63 = vector.load %arg16[%c0_60, %c0_61] : memref<8x16xf32, #tpu.memory_space<vmem>>, vector<8x16xf32>
      tpu.vector_store %arg16[%c0_60, %c0_61], %62 {strides = array<i32>} : memref<8x16xf32, #tpu.memory_space<vmem>>, vector<8x16xf32>,
      %cst_62 = arith.constant 0.000000e+00 : f32
      %64 = vector.broadcast %cst_62 : f32 to vector<8x16xf32>
      %c0_63 = arith.constant 0 : index
      %c0_64 = arith.constant 0 : index
      %65 = vector.load %arg17[%c0_63, %c0_64] : memref<8x16xf32, #tpu.memory_space<vmem>>, vector<8x16xf32>
      tpu.vector_store %arg17[%c0_63, %c0_64], %64 {strides = array<i32>} : memref<8x16xf32, #tpu.memory_space<vmem>>, vector<8x16xf32>,
    } else {
    }
    %c0 = arith.constant 0 : index
    %c0_1 = arith.constant 0 : index
    %3 = vector.load %arg14[%c0, %c0_1] : memref<8x32xf32, #tpu.memory_space<vmem>>, vector<8x32xf32>
    %c0_2 = arith.constant 0 : index
    %c0_3 = arith.constant 0 : index
    %c0_4 = arith.constant 0 : index
    %4 = vector.load %arg5[%c0_2, %c0_3, %c0_4] : memref<1x32x32xf32, #tpu.memory_space<vmem>>, vector<1x32x32xf32>
    %5 = vector.shape_cast %4 : vector<1x32x32xf32> to vector<32x32xf32>
    %cst = arith.constant dense<0.000000e+00> : vector<8x32xf32>
    %6 = tpu.matmul %3, %5, %cst {dimension_numbers = #tpu.dot_dimension_numbers<[1], [0], [0], [1], [0, 0, 1, 1], [], []>} : vector<8x32xf32>, vector<32x32xf32>, vector<8x32xf32> -> vector<8x32xf32>
    %c0_5 = arith.constant 0 : index
    %c0_6 = arith.constant 0 : index
    %c0_7 = arith.constant 0 : index
    %7 = vector.load %arg6[%c0_5, %c0_6, %c0_7] : memref<1x1x32xf32, #tpu.memory_space<vmem>>, vector<1x1x32xf32>
    %8 = vector.shape_cast %7 : vector<1x1x32xf32> to vector<1x32xf32>
    %9 = vector.broadcast %8 : vector<1x32xf32> to vector<8x32xf32>
    %10 = arith.addf %6, %9 : vector<8x32xf32>
    %c0_8 = arith.constant 0 : index
    %c0_9 = arith.constant 0 : index
    %11 = vector.load %arg15[%c0_8, %c0_9] : memref<8x32xf32, #tpu.memory_space<vmem>>, vector<8x32xf32>
    %c0_10 = arith.constant 0 : index
    %c0_11 = arith.constant 0 : index
    %c0_12 = arith.constant 0 : index
    %12 = vector.load %arg7[%c0_10, %c0_11, %c0_12] : memref<1x32x32xf32, #tpu.memory_space<vmem>>, vector<1x32x32xf32>
    %13 = vector.shape_cast %12 : vector<1x32x32xf32> to vector<32x32xf32>
    %cst_13 = arith.constant dense<0.000000e+00> : vector<8x32xf32>
    %14 = tpu.matmul %11, %13, %cst_13 {dimension_numbers = #tpu.dot_dimension_numbers<[1], [0], [0], [1], [0, 0, 1, 1], [], []>} : vector<8x32xf32>, vector<32x32xf32>, vector<8x32xf32> -> vector<8x32xf32>
    %c0_14 = arith.constant 0 : index
    %c0_15 = arith.constant 0 : index
    %c0_16 = arith.constant 0 : index
    %15 = vector.load %arg8[%c0_14, %c0_15, %c0_16] : memref<1x1x32xf32, #tpu.memory_space<vmem>>, vector<1x1x32xf32>
    %16 = vector.shape_cast %15 : vector<1x1x32xf32> to vector<1x32xf32>
    %17 = vector.broadcast %16 : vector<1x32xf32> to vector<8x32xf32>
    %18 = arith.addf %14, %17 : vector<8x32xf32>
    %c0_17 = arith.constant 0 : index
    %c0_18 = arith.constant 0 : index
    %19 = vector.load %arg16[%c0_17, %c0_18] : memref<8x16xf32, #tpu.memory_space<vmem>>, vector<8x16xf32>
    %c0_19 = arith.constant 0 : index
    %c0_20 = arith.constant 0 : index
    %c0_21 = arith.constant 0 : index
    %20 = vector.load %arg9[%c0_19, %c0_20, %c0_21] : memref<1x16x16xf32, #tpu.memory_space<vmem>>, vector<1x16x16xf32>
    %21 = vector.shape_cast %20 : vector<1x16x16xf32> to vector<16x16xf32>
    %cst_22 = arith.constant dense<0.000000e+00> : vector<8x16xf32>
    %22 = tpu.matmul %19, %21, %cst_22 {dimension_numbers = #tpu.dot_dimension_numbers<[1], [0], [0], [1], [0, 0, 1, 1], [], []>} : vector<8x16xf32>, vector<16x16xf32>, vector<8x16xf32> -> vector<8x16xf32>
    %c0_23 = arith.constant 0 : index
    %c0_24 = arith.constant 0 : index
    %c0_25 = arith.constant 0 : index
    %23 = vector.load %arg10[%c0_23, %c0_24, %c0_25] : memref<1x1x16xf32, #tpu.memory_space<vmem>>, vector<1x1x16xf32>
    %24 = vector.shape_cast %23 : vector<1x1x16xf32> to vector<1x16xf32>
    %25 = vector.broadcast %24 : vector<1x16xf32> to vector<8x16xf32>
    %26 = arith.addf %22, %25 : vector<8x16xf32>
    %c0_26 = arith.constant 0 : index
    %c0_27 = arith.constant 0 : index
    %27 = vector.load %arg14[%c0_26, %c0_27] : memref<8x32xf32, #tpu.memory_space<vmem>>, vector<8x32xf32>
    tpu.vector_store %arg14[%c0_26, %c0_27], %10 {strides = array<i32>} : memref<8x32xf32, #tpu.memory_space<vmem>>, vector<8x32xf32>,
    %c0_28 = arith.constant 0 : index
    %c0_29 = arith.constant 0 : index
    %28 = vector.load %arg15[%c0_28, %c0_29] : memref<8x32xf32, #tpu.memory_space<vmem>>, vector<8x32xf32>
    tpu.vector_store %arg15[%c0_28, %c0_29], %18 {strides = array<i32>} : memref<8x32xf32, #tpu.memory_space<vmem>>, vector<8x32xf32>,
    %c0_30 = arith.constant 0 : index
    %c0_31 = arith.constant 0 : index
    %29 = vector.load %arg16[%c0_30, %c0_31] : memref<8x16xf32, #tpu.memory_space<vmem>>, vector<8x16xf32>
    tpu.vector_store %arg16[%c0_30, %c0_31], %26 {strides = array<i32>} : memref<8x16xf32, #tpu.memory_space<vmem>>, vector<8x16xf32>,
    %cst_32 = arith.constant 3.200000e+01 : f32
    %30 = math.sqrt %cst_32 : f32
    %cst_33 = arith.constant 1.000000e+00 : f32
    %31 = arith.divf %cst_33, %30 : f32
    %32 = vector.broadcast %31 : f32 to vector<8x32xf32>
    %33 = arith.mulf %10, %32 : vector<8x32xf32>
    %cst_34 = arith.constant dense<0.000000e+00> : vector<8x8xf32>
    %34 = tpu.matmul %33, %18, %cst_34 {dimension_numbers = #tpu.dot_dimension_numbers<[1], [1], [0], [0], [0, 0, 1, 0], [], []>} : vector<8x32xf32>, vector<8x32xf32>, vector<8x8xf32> -> vector<8x8xf32>
    %cst_35 = arith.constant dense<0xFF800000> : vector<8xf32>
    %35 = vector.multi_reduction <maximumf>, %34, %cst_35 [1] : vector<8x8xf32> to vector<8xf32>
    %36 = vector.shape_cast %35 : vector<8xf32> to vector<8x1xf32>
    %37 = vector.broadcast %36 : vector<8x1xf32> to vector<8x8xf32>
    %38 = arith.subf %34, %37 : vector<8x8xf32>
    %39 = math.exp %38 : vector<8x8xf32>
    %cst_36 = arith.constant dense<0.000000e+00> : vector<8xf32>
    %40 = vector.multi_reduction <add>, %39, %cst_36 [1] : vector<8x8xf32> to vector<8xf32>
    %41 = vector.shape_cast %40 : vector<8xf32> to vector<8x1xf32>
    %42 = tpu.reciprocal %41 {approx = true} : vector<8x1xf32> -> vector<8x1xf32>
    %43 = vector.broadcast %42 : vector<8x1xf32> to vector<8x8xf32>
    %44 = arith.mulf %39, %43 : vector<8x8xf32>
    %cst_37 = arith.constant dense<0.000000e+00> : vector<8x16xf32>
    %45 = tpu.matmul %44, %26, %cst_37 {dimension_numbers = #tpu.dot_dimension_numbers<[1], [0], [0], [1], [0, 0, 1, 1], [], []>} : vector<8x8xf32>, vector<8x16xf32>, vector<8x16xf32> -> vector<8x16xf32>
    %c0_38 = arith.constant 0 : index
    %c0_39 = arith.constant 0 : index
    %46 = vector.load %arg17[%c0_38, %c0_39] : memref<8x16xf32, #tpu.memory_space<vmem>>, vector<8x16xf32>
    %c0_40 = arith.constant 0 : index
    %c0_41 = arith.constant 0 : index
    %c0_42 = arith.constant 0 : index
    %47 = vector.load %arg11[%c0_40, %c0_41, %c0_42] : memref<1x16x16xf32, #tpu.memory_space<vmem>>, vector<1x16x16xf32>
    %48 = vector.shape_cast %47 : vector<1x16x16xf32> to vector<16x16xf32>
    %cst_43 = arith.constant dense<0.000000e+00> : vector<8x16xf32>
    %49 = tpu.matmul %45, %48, %cst_43 {dimension_numbers = #tpu.dot_dimension_numbers<[1], [0], [0], [1], [0, 0, 1, 1], [], []>} : vector<8x16xf32>, vector<16x16xf32>, vector<8x16xf32> -> vector<8x16xf32>
    %50 = arith.addf %46, %49 : vector<8x16xf32>
    %c0_44 = arith.constant 0 : index
    %c0_45 = arith.constant 0 : index
    %51 = vector.load %arg17[%c0_44, %c0_45] : memref<8x16xf32, #tpu.memory_space<vmem>>, vector<8x16xf32>
    tpu.vector_store %arg17[%c0_44, %c0_45], %50 {strides = array<i32>} : memref<8x16xf32, #tpu.memory_space<vmem>>, vector<8x16xf32>,
    %c3_i32 = arith.constant 3 : i32
    %52 = arith.cmpi eq, %arg1, %c3_i32 : i32
    %53 = arith.extui %52 : i1 to i32
    %c0_i32_46 = arith.constant 0 : i32
    %54 = arith.cmpi ne, %53, %c0_i32_46 : i32
    scf.if %54 {
      %c0_47 = arith.constant 0 : index
      %c0_48 = arith.constant 0 : index
      %55 = vector.load %arg17[%c0_47, %c0_48] : memref<8x16xf32, #tpu.memory_space<vmem>>, vector<8x16xf32>
      %c0_49 = arith.constant 0 : index
      %c0_50 = arith.constant 0 : index
      %56 = vector.load %arg12[%c0_49, %c0_50] : memref<1x16xf32, #tpu.memory_space<vmem>>, vector<1x16xf32>
      %57 = vector.broadcast %56 : vector<1x16xf32> to vector<8x16xf32>
      %58 = arith.addf %55, %57 : vector<8x16xf32>
      %c0_51 = arith.constant 0 : index
      %c0_52 = arith.constant 0 : index
      %c0_53 = arith.constant 0 : index
      %59 = vector.load %arg13[%c0_51, %c0_52, %c0_53] : memref<1x8x16xf32, #tpu.memory_space<vmem>>, vector<1x8x16xf32>
      %60 = vector.shape_cast %59 : vector<1x8x16xf32> to vector<8x16xf32>
      %61 = vector.shape_cast %58 : vector<8x16xf32> to vector<1x8x16xf32>
      tpu.vector_store %arg13[%c0_51, %c0_52, %c0_53], %61 {strides = array<i32>} : memref<1x8x16xf32, #tpu.memory_space<vmem>>, vector<1x8x16xf32>,
    } else {
    }
    return
  }
  func.func @transform_0(%arg0: i32, %arg1: i32) -> (i32, i32, i32) {
    %c0_i32 = arith.constant 0 : i32
    %c0_i32_0 = arith.constant 0 : i32
    %c0_i32_1 = arith.constant 0 : i32
    return %arg0, %c0_i32, %c0_i32_0 : i32, i32, i32
  }
  func.func @transform_1(%arg0: i32, %arg1: i32) -> (i32, i32, i32) {
    %c0_i32 = arith.constant 0 : i32
    %c0_i32_0 = arith.constant 0 : i32
    %c0_i32_1 = arith.constant 0 : i32
    return %arg0, %c0_i32, %c0_i32_0 : i32, i32, i32
  }
  func.func @transform_2(%arg0: i32, %arg1: i32) -> (i32, i32, i32) {
    %c0_i32 = arith.constant 0 : i32
    %c0_i32_0 = arith.constant 0 : i32
    %c0_i32_1 = arith.constant 0 : i32
    return %arg0, %c0_i32, %c0_i32_0 : i32, i32, i32
  }
  func.func @transform_3(%arg0: i32, %arg1: i32) -> (i32, i32, i32) {
    %c0_i32 = arith.constant 0 : i32
    %c0_i32_0 = arith.constant 0 : i32
    %c0_i32_1 = arith.constant 0 : i32
    return %arg1, %c0_i32, %c0_i32_0 : i32, i32, i32
  }
  func.func @transform_4(%arg0: i32, %arg1: i32) -> (i32, i32, i32) {
    %c0_i32 = arith.constant 0 : i32
    %c0_i32_0 = arith.constant 0 : i32
    %c0_i32_1 = arith.constant 0 : i32
    return %arg1, %c0_i32, %c0_i32_0 : i32, i32, i32
  }
  func.func @transform_5(%arg0: i32, %arg1: i32) -> (i32, i32, i32) {
    %c0_i32 = arith.constant 0 : i32
    %c0_i32_0 = arith.constant 0 : i32
    %c0_i32_1 = arith.constant 0 : i32
    return %arg1, %c0_i32, %c0_i32_0 : i32, i32, i32
  }
  func.func @transform_6(%arg0: i32, %arg1: i32) -> (i32, i32, i32) {
    %c0_i32 = arith.constant 0 : i32
    %c0_i32_0 = arith.constant 0 : i32
    %c0_i32_1 = arith.constant 0 : i32
    return %arg1, %c0_i32, %c0_i32_0 : i32, i32, i32
  }
  func.func @transform_7(%arg0: i32, %arg1: i32) -> (i32, i32, i32) {
    %c0_i32 = arith.constant 0 : i32
    %c0_i32_0 = arith.constant 0 : i32
    %c0_i32_1 = arith.constant 0 : i32
    return %arg1, %c0_i32, %c0_i32_0 : i32, i32, i32
  }
  func.func @transform_8(%arg0: i32, %arg1: i32) -> (i32, i32, i32) {
    %c0_i32 = arith.constant 0 : i32
    %c0_i32_0 = arith.constant 0 : i32
    %c0_i32_1 = arith.constant 0 : i32
    return %arg1, %c0_i32, %c0_i32_0 : i32, i32, i32
  }
  func.func @transform_9(%arg0: i32, %arg1: i32) -> (i32, i32, i32) {
    %c0_i32 = arith.constant 0 : i32
    %c0_i32_0 = arith.constant 0 : i32
    %c0_i32_1 = arith.constant 0 : i32
    return %arg1, %c0_i32, %c0_i32_0 : i32, i32, i32
  }
  func.func @transform_10(%arg0: i32, %arg1: i32) -> (i32, i32) {
    %c0_i32 = arith.constant 0 : i32
    %c0_i32_0 = arith.constant 0 : i32
    %c0_i32_1 = arith.constant 0 : i32
    return %c0_i32, %c0_i32_0 : i32, i32
  }
  func.func @transform_11(%arg0: i32, %arg1: i32) -> (i32, i32, i32) {
    %c0_i32 = arith.constant 0 : i32
    %c0_i32_0 = arith.constant 0 : i32
    %c0_i32_1 = arith.constant 0 : i32
    return %arg0, %c0_i32, %c0_i32_0 : i32, i32, i32
  }
}

</mosaic_0001>

<bundles_post_ra>
// kernel: tpu_custom_call.1
= control target key start
LH: loop header
LB: loop body
LE: loop exit
PB: predicated region body
PF: predicated region fallthrough
CT: control target
= control target key end

     0   :  { %s2309_s0 = inlined_call_operand.hbm [shape: f32[2,8,32], index: 0, kind: input, shape index: {}]   ;;  %s2310_s1 = inlined_call_operand.hbm [shape: f32[2,8,32], index: 1, kind: input, shape index: {}]   ;;  %s2311_s2 = inlined_call_operand.hbm [shape: f32[2,8,16], index: 2, kind: input, shape index: {}]   ;;  %s2312_s3 = inlined_call_operand.hbm [shape: f32[4,32,32], index: 3, kind: input, shape index: {}]   ;;  %s2313_s4 = inlined_call_operand.hbm [shape: f32[4,1,32], index: 4, kind: input, shape index: {}]   ;;  %s2314_s5 = inlined_call_operand.hbm [shape: f32[4,32,32], index: 5, kind: input, shape index: {}]   ;;  %s2315_s6 = inlined_call_operand.vmem [shape: f32[4,1,32], index: 6, kind: input, shape index: {}]   ;;  %s2316_s7 = inlined_call_operand.hbm [shape: f32[4,16,16], index: 7, kind: input, shape index: {}]   ;;  %s2317_s8 = inlined_call_operand.hbm [shape: f32[4,1,16], index: 8, kind: input, shape index: {}]   ;;  %s2318_s9 = inlined_call_operand.hbm [shape: f32[4,16,16], index: 9, kind: input, shape index: {}]   ;;  %s2319_s10 = inlined_call_operand.vmem [shape: f32[1,16], index: 10, kind: input, shape index: {}]   ;;  %s2320_s11 = inlined_call_operand.hbm [shape: f32[2,8,16], index: 11, kind: output, shape index: {}]  }
   0x1   :  { %2348 = sst [smem:[#allocation44_spill]] %s2310_s1 }
   0x2   :  { %2349 = sst [smem:[#allocation45_spill]] %s2312_s3 }
   0x3   :  { %2350 = sst [smem:[#allocation46_spill]] %s2315_s6 }
   0x4   :  { %2351 = sst [smem:[#allocation47_spill]] %s2319_s10 }
   0x5   :  { %2352 = sst [smem:[#allocation48_spill]] %s2320_s11 }
   0x6   :  { %16 = vsyncpa [#allocation7], 0 }
   0x7   :  { %18 = vsyncpa [#allocation7 + $0x1], 0 }
   0x8   :  { %19 = vsyncpa [#allocation10], 0 }
   0x9   :  { %21 = vsyncpa [#allocation10 + $0x1], 0 }
   0xa   :  { %22 = vsyncpa [#allocation13], 0 }
   0xb   :  { %24 = vsyncpa [#allocation13 + $0x1], 0 }
   0xc   :  { %25 = vsyncpa [#allocation16], 0 }
   0xd   :  { %27 = vsyncpa [#allocation16 + $0x1], 0 }
   0xe   :  { %28 = vsyncpa [#allocation19], 0 }
   0xf   :  { %30 = vsyncpa [#allocation19 + $0x1], 0 }
  0x10   :  { %31 = vsyncpa [#allocation8], 0 }
  0x11   :  { %33 = vsyncpa [#allocation8 + $0x1], 0  ;;  %s1891_s17 = smov 0   ;;  %s1893_s18 = smov 0  }
  0x12   :  { %s1895_s19 = smov 0   ;;  %s1897_s20 = smov 0  }
  0x13   :  { %s1899_s21 = smov 0   ;;  %s1901_s22 = smov 0  }
  0x14   :  { %s1903_s23 = smov 0   ;;  %s1905_s24 = smov 0  }
  0x15   :  { %s1907_s25 = smov 0   ;;  %s1909_s26 = smov 0  }
  0x16   :  { %s1911_s27 = smov 0  }
  0x17 LB: > { %2353 = sst [smem:[#allocation28_spill]] %s1790_s18  ;;  %s1947_s28 = sadd.s32 4294967295, %s1826_s27   ;;  %s1826_s27 = sphi %s1911_s27, %s39_s27   ;;  %s1822_s26 = sphi %s1909_s26, %s2409_s26   ;;  %s1818_s25 = sphi %s1907_s25, %s2414_s25   ;;  %s1814_s24 = sphi %s1905_s24, %s2407_s24   ;;  %s1810_s23 = sphi %s1903_s23, %s2413_s23   ;;  %s1806_s22 = sphi %s1901_s22, %s2412_s22   ;;  %s1802_s21 = sphi %s1899_s21, %s2411_s21   ;;  %s1798_s20 = sphi %s1897_s20, %s2410_s20   ;;  %s1794_s19 = sphi %s1895_s19, %s2405_s19   ;;  %s1790_s18 = sphi %s1893_s18, %s2404_s18   ;;  %s1786_s17 = sphi %s1891_s17, %s2403_s17  }
  0x18   : > { %2354 = sst [smem:[#allocation29_spill]] %s1794_s19  ;;  %s1218_s29 = sadd.s32 4294967294, %s1826_s27  }
  0x19   : > { %2355 = sst [smem:[#allocation30_spill]] %s1798_s20  ;;  %s48_s30 = sadd.s32 1, %s1818_s25 }
  0x1a   : > { %2356 = sst [smem:[#allocation31_spill]] %s1810_s23  ;;  %s51_s12 = sadd.s32 1, %s1822_s26 }
  0x1b   : > { %2357 = sst [smem:[#allocation32_spill]] %s1814_s24  ;;  %p49_p0 = scmp.ge.s32.totalorder %s48_s30, 4 }
  0x1c   : > { %2358 = sst [smem:[#allocation33_spill]] %s1822_s26  ;;  %s58_s13 = sadd.s32 1, %s1806_s22 }
  0x1d   : > { %2359 = sst [smem:[#allocation34_spill]] %s1826_s27  ;;  %p65_p1 = scmp.ne.s32.totalorder %s1806_s22, %s1802_s21 }
  0x1e   : > { %2360 = sst [smem:[#allocation35_spill]] %s1947_s28  ;;  %p66_p2 = scmp.eq.s32.totalorder %s1826_s27, 0 }
  0x1f   : > { %s2416_s30 = smov (%p49_p0, %s48_s30), 0  ;;  %s2418_s12 = smov (!%p49_p0, %s51_s12), %s1822_s26 }
  0x20   : > { %2361 = sst [smem:[#allocation36_spill]] %s2416_s30  ;;  %p1964_p3 = por %p66_p2, %p65_p1 }
  0x21   : > { %p2323_p4 = scmp.ne.s32.totalorder %s1802_s21, %s1798_s20  ;;  %p53_p5 = scmp.ge.s32.totalorder %s2418_s12, 2 }
  0x22   : > { %p72_p6 = scmp.eq.s32.totalorder %s1947_s28, 0  ;;  %s133_s15 = ssub.s32 %s1818_s25, %s2416_s30 }
  0x23   : > { %s136_s16 = sadd.s32 1, %s1794_s19  ;;  %s2420_s12 = smov (%p53_p5, %s2418_s12), 0 }
  0x24   : > { %2363 = sst [smem:[#allocation37_spill]] %s2420_s12  ;;  %p1981_p7 = por %p72_p6, %p2323_p4 }
  0x25   : > { %p134_p8 = scmp.eq.s32.totalorder %s133_s15, 0  ;;  %s55_s24 = ssub.s32 %s1822_s26, %s2420_s12 }
  0x26   : > { %s2364_s11 = scalar_select %p1981_p7, 1, 0 }
  0x27   : > { %p143_p9 = scmp.ne.s32.totalorder %s1794_s19, %s1790_s18  ;;  %p56_p10 = scmp.eq.s32.totalorder %s55_s24, 0 }
  0x28   : > { %2365 = sst [smem:[#allocation38_spill]] %s2364_s11  ;;  %p149_p11 = scmp.ne.s32.totalorder %s1790_s18, %s1786_s17 }
  0x29   : > { %s1992_s30 = scalar_select %p134_p8, %s1794_s19, %s136_s16  }
  0x2a   : > { %s1995_s10 = scalar_select %p56_p10, %s1806_s22, %s58_s13  }
  0x2b   : > { %2366 = sst [smem:[#allocation39_spill]] %s1992_s30  ;;  %p1999_p12 = por %p143_p9, %p66_p2 }
  0x2c   : > { %2367 = sst [smem:[#allocation40_spill]] %s1995_s10  ;;  %p2005_p13 = por %p149_p11, %p72_p6 }
  0x2d   : > { %p350_p0 = scmp.eq.s32.totalorder %s1947_s28, 7  ;;  %p356_p5 = scmp.eq.s32.totalorder %s1218_s29, 7 }
  0x2e   : > { %s2369_s15 = scalar_select %p2005_p13, 1, 0 }
  0x2f   : > { %p1317_p4 = scmp.lt.s32.totalorder %s1826_s27, 8  ;;  %p2014_p8 = por %p350_p0, %p65_p1 }
  0x30   : > { %2370 = sst [smem:[#allocation41_spill]] %s2369_s15  ;;  %p2373_p10 = scmp.ne.s32.totalorder %s1802_s21, %s1798_s20 }
  0x31   : > { %s2371_s17 = scalar_select %p2014_p8, 1, 0 }
  0x32   : > { %p2021_p2 = por %p356_p5, %p2373_p10  ;;  %s2330_s13 = sand.u32 1, %s1806_s22  }
  0x33   : > { %2372 = sst [smem:[#allocation42_spill]] %s2371_s17  ;;  %s2027_s16 = sshll.u32 %s1822_s26, 3 }
  0x34   : > { %s2374_s24 = scalar_select %p2021_p2, 1, 0 }
  0x35   : > { %s2031_s29 = sshll.u32 %s2330_s13, 3  ;;  %p2037_p1 = pnand %p1317_p4, %p1964_p3 }
  0x36   : > { %2375 = sst [smem:[#allocation43_spill]] %s2374_s24  ;;  %s2042_s10 = sand.u32 1, %s1826_s27  }
  0x37   : > { %s2377_s1 = sld [smem:[#allocation44_spill]]  ;;  %s402_s20 = scalar_lea.vmem [#allocation9], %s2031_s29 }
  0x38   : > { %s410_s17 = sshll.u32 %s402_s20, 4  ;;  %p2053_p3 = pnand %p1317_p4, %p1999_p12  ;;  %s411_s17 = int_to_ptr.vmem [resolvable:$true] %s410_s17 }
  0x39   : > { %s2335_s23 = scalar_lea.sflag [#allocation10], %s2042_s10  ;;  %p1239_p6 = scmp.ge.s32.totalorder %s1826_s27, 1 }
  0x3a   : > { %p562_p9 = scmp.lt.s32.totalorder %s1826_s27, 9  ;;  %s2065_s30 = sand.u32 1, %s1794_s19  }
  0x3b   : > { %s1261_s20 = sshll.u32 %s1818_s25, 5  ;;  %s2380_s3 = sld [smem:[#allocation45_spill]] }
  0x3c   : > { %p2068_p11 = pnand %p1239_p6, %p562_p9  ;;  %s2343_s19 = smov 128  }
  0x3d   : > { %s406_s26 = scalar_lea.hbm %s2377_s1, %s2027_s16  ;;  %s2346_s27 = smov 8  }
  0x3e   : > { %s408_s13 = sshll.u32 %s406_s26, 4  ;;  %s1227_s26 = sshll.u32 %s2065_s30, 5  ;;  %s409_s13 = int_to_ptr.hbm [resolvable:$true] %s408_s13 }
  0x3f   : > { %1291 = dma.hbm_to_vmem [thread:$0]  (!%p2037_p1), %s409_s13, 128, %s411_s17, %s2335_s23  }
  0x40   : > { %s440_s17 = scalar_lea.vmem [#allocation12], %s1227_s26  ;;  %s437_s23 = scalar_lea.sflag [#allocation13], %s2042_s10 }
  0x41   : > { %s445_s15 = scalar_lea.hbm %s2380_s3, %s1261_s20  ;;  %s448_s13 = sshll.u32 %s440_s17, 4  ;;  %s449_s13 = int_to_ptr.vmem [resolvable:$true] %s448_s13 }
  0x42   : > { %s446_s18 = sshll.u32 %s445_s15, 4  ;;  %s484_s24 = scalar_lea.hbm %s2314_s5, %s1261_s20  ;;  %s447_s18 = int_to_ptr.hbm [resolvable:$true] %s446_s18 }
  0x43   : > { %1297 = dma.hbm_to_vmem [thread:$0]  (!%p2053_p3), %s447_s18, 512, %s449_s13, %s437_s23, %s2343_s19, %s2343_s19, %s2346_s27  }
  0x44   : > { %s479_s17 = scalar_lea.vmem [#allocation15], %s1227_s26  ;;  %s485_s28 = sshll.u32 %s484_s24, 4  ;;  %s486_s28 = int_to_ptr.hbm [resolvable:$true] %s485_s28 }
  0x45   : > { %s487_s3 = sshll.u32 %s479_s17, 4  ;;  %s2342_s11 = scalar_lea.sflag [#allocation16], %s2042_s10  ;;  %s488_s3 = int_to_ptr.vmem [resolvable:$true] %s487_s3 }
  0x46   : > { %1303 = dma.hbm_to_vmem [thread:$0]  (!%p2053_p3), %s486_s28, 512, %s488_s3, %s2342_s11, %s2343_s19, %s2343_s19, %s2346_s27  }
  0x47   : > { %s531_s20 = scalar_lea.hbm %s2317_s8, %s1818_s25  ;;  %s528_s1 = scalar_lea.vmem [#allocation18], %s2065_s30 }
  0x48   : > { %s533_s26 = sshll.u32 %s531_s20, 4  ;;  %s535_s15 = sshll.u32 %s528_s1, 4  ;;  %s534_s26 = int_to_ptr.hbm [resolvable:$true] %s533_s26  ;;  %s536_s15 = int_to_ptr.vmem [resolvable:$true] %s535_s15 }
  0x49   : > { %s2345_s24 = scalar_lea.sflag [#allocation19], %s2042_s10  ;;  %s387_s28 = scalar_lea.hbm %s2309_s0, %s2027_s16 }
  0x4a   : > { %1309 = dma.hbm_to_vmem [thread:$0]  (!%p2053_p3), %s534_s26, 16, %s536_s15, %s2345_s24  }
  0x4b   : > { %s383_s18 = scalar_lea.vmem [#allocation6], %s2031_s29  ;;  %s389_s20 = sshll.u32 %s387_s28, 4  ;;  %s390_s20 = int_to_ptr.hbm [resolvable:$true] %s389_s20 }
  0x4c   : > { %s391_s13 = sshll.u32 %s383_s18, 4  ;;  %s2381_s1 = sand.u32 1, %s1806_s22   ;;  %s392_s13 = int_to_ptr.vmem [resolvable:$true] %s391_s13 }
  0x4d   : > { %s380_s11 = scalar_lea.sflag [#allocation7], %s2381_s1  ;;  %s425_s15 = scalar_lea.hbm %s2311_s2, %s2027_s16 }
  0x4e   : > { %1288 = dma.hbm_to_vmem [thread:$0]  (!%p2037_p1), %s390_s20, 128, %s392_s13, %s380_s11  }
  0x4f   : > { %s421_s17 = scalar_lea.vmem [#allocation11], %s2031_s29  ;;  %s427_s24 = sshll.u32 %s425_s15, 4  ;;  %s428_s24 = int_to_ptr.hbm [resolvable:$true] %s427_s24 }
  0x50   : > { %s429_s3 = sshll.u32 %s421_s17, 4  ;;  %s2382_s28 = scalar_lea.sflag [#allocation10], %s2042_s10  ;;  %s430_s3 = int_to_ptr.vmem [resolvable:$true] %s429_s3 }
  0x51   : > { %1294 = dma.hbm_to_vmem [thread:$0]  (!%p2037_p1), %s428_s24, 128, %s430_s3, %s2382_s28  }
  0x52   : > { %s464_s1 = scalar_lea.hbm %s2313_s4, %s1818_s25  ;;  %s461_s11 = scalar_lea.vmem [#allocation14], %s2065_s30 }
  0x53   : > { %s468_s13 = sshll.u32 %s461_s11, 4  ;;  %s466_s20 = sshll.u32 %s464_s1, 4  ;;  %s469_s13 = int_to_ptr.vmem [resolvable:$true] %s468_s13  ;;  %s467_s20 = int_to_ptr.hbm [resolvable:$true] %s466_s20 }
  0x54   : > { %s1233_s19 = sshll.u32 %s2065_s30, 4  ;;  %s1263_s12 = sshll.u32 %s1818_s25, 4 }
  0x55   : > { %1300 = dma.hbm_to_vmem [thread:$0]  (!%p2053_p3), %s467_s20, 16, %s469_s13, %s437_s23  }
  0x56   : > { %s512_s24 = scalar_lea.hbm %s2316_s7, %s1263_s12  ;;  %s507_s27 = scalar_lea.vmem [#allocation17], %s1233_s19 }
  0x57   : > { %s515_s26 = sshll.u32 %s507_s27, 4  ;;  %s513_s15 = sshll.u32 %s512_s24, 4  ;;  %s516_s26 = int_to_ptr.vmem [resolvable:$true] %s515_s26  ;;  %s514_s15 = int_to_ptr.hbm [resolvable:$true] %s513_s15 }
  0x58   : > { %s2383_s17 = smov 8   ;;  %s2384_s3 = smov 128  }
  0x59   : > { %s2385_s30 = scalar_lea.sflag [#allocation16], %s2042_s10  ;;  %s551_s23 = scalar_lea.hbm %s2318_s9, %s1263_s12 }
  0x5a   : > { %1306 = dma.hbm_to_vmem [thread:$0]  (!%p2053_p3), %s514_s15, 256, %s516_s26, %s2385_s30, %s2384_s3, %s2384_s3, %s2383_s17  }
  0x5b   : > { %s546_s1 = scalar_lea.vmem [#allocation20], %s1233_s19  ;;  %s552_s13 = sshll.u32 %s551_s23, 4  ;;  %s553_s13 = int_to_ptr.hbm [resolvable:$true] %s552_s13 }
  0x5c   : > { %s554_s11 = sshll.u32 %s546_s1, 4  ;;  %s2386_s20 = scalar_lea.sflag [#allocation19], %s2042_s10  ;;  %s555_s11 = int_to_ptr.vmem [resolvable:$true] %s554_s11 }
  0x5d   : > { %1312 = dma.hbm_to_vmem [thread:$0]  (!%p2053_p3), %s553_s13, 256, %s555_s11, %s2386_s20, %s2384_s3, %s2384_s3, %s2383_s17  }
  0x5e   : > { %566 = sbr.rel (%p2068_p11) target bundleno = 966 (0x3c6), region = 64  ;;  %s2157_s29 = sand.u32 (!%p2068_p11), 1, %s1802_s21  }
  0x5f   : > { %s2160_s19 = sshll.u32 (!%p2068_p11), %s2157_s29, 3  ;;  %s569_s12 = scalar_lea.sflag (!%p2068_p11), [#allocation7], %s2157_s29 }
  0x60   : > { %s572_s24 = scalar_lea.vmem (!%p2068_p11), [#allocation6], %s2160_s19 }
  0x63   : > { %1761 = dma.done.wait (%p1981_p7), %s569_s12, 128  }
  0x64   : > { %1763 = vsyncadd (%p1981_p7), %s569_s12, 4294967168  ;;  %s2388_s10 = sld [smem:[#allocation35_spill]]  ;;  %s582_s27 = scalar_lea.vmem [#allocation9], %s2160_s19 }
  0x6a   : > { %s578_s14 = sand.u32 1, %s2388_s10  }
  0x6b   : > { %s579_s6 = scalar_lea.sflag [#allocation10], %s578_s14 }
  0x6c   : > { %1765 = dma.done.wait (%p1981_p7), %s579_s6, 256  }
  0x6d   : > { %1767 = vsyncadd (%p1981_p7), %s579_s6, 4294967040  ;;  %s2389_s26 = sld [smem:[#allocation28_spill]]  ;;  %s592_s30 = scalar_lea.vmem [#allocation11], %s2160_s19 }
  0x6e   : > { %s599_s28 = scalar_lea.sflag [#allocation13], %s578_s14 }
  0x73   : > { %s2175_s17 = sand.u32 1, %s2389_s26  }
  0x74   : > { %s1243_s3 = sshll.u32 %s2175_s17, 5 }
  0x75   : > { %s2179_s18 = scalar_lea.vmem [#allocation12], %s1243_s3 }
  0x76   : > { %1769 = dma.done.wait (%p2005_p13), %s599_s28, 528  }
  0x77   : > { %1771 = vsyncadd (%p2005_p13), %s599_s28, 4294966768  ;;  %s618_s1 = scalar_lea.sflag [#allocation16], %s578_s14  ;;  %s2186_s11 = scalar_lea.vmem [#allocation15], %s1243_s3 }
  0x78   : > { %1773 = dma.done.wait (%p2005_p13), %s618_s1, 768  }
  0x79   : > { %1775 = vsyncadd (%p2005_p13), %s618_s1, 4294966528  ;;  %s1245_s13 = sshll.u32 %s2175_s17, 4  ;;  %s638_s16 = scalar_lea.sflag [#allocation19], %s578_s14 }
  0x7a   : > { %s2193_s20 = scalar_lea.vmem [#allocation17], %s1245_s13  ;;  %s640_s12 = scalar_lea.vmem [#allocation18], %s2175_s17 }
  0x7b   : > { %1777 = dma.done.wait (%p2005_p13), %s638_s16, 272  }
  0x7c   : > { %1779 = vsyncadd (%p2005_p13), %s638_s16, 4294967024  ;;  %s2391_s10 = sld [smem:[#allocation31_spill]]  ;;  %s2208_s23 = scalar_lea.vmem [#allocation20], %s1245_s13 }
  0x7d   : > { %s2392_s28 = sld [smem:[#allocation46_spill]]  ;;  %s730_s14 = scalar_lea.vmem [#allocation21], %s2160_s19 }
  0x82   : > { %p731_p4 = scmp.lt.s32.totalorder %s2391_s10, 3  ;;  %p1248_p7 = scmp.ne.s32.totalorder %s2391_s10, 0 }
  0x84   : > { %s2202_s6 = scalar_select %p731_p4, %s2391_s10, 3 }
  0x85   : > { %737 = sbr.rel (%p1248_p7) target bundleno = 143 (0x8f), region = 104 }
  0x86   : > { %s733_s1 = scalar_lea.vmem %s2392_s28, %s2202_s6 }
  0x8a   : > { %v738_v0 = vld [vmem:[%s572_s24] sm:$0xff]  ;;  %vm739_vm0 = vcmask 261120   ;;  %v741_v1 = vld [vmem:[%s582_s27] sm:$0xff]  ;;  %vm744_vm1 = vcmask 130048   ;;  %v1830_v3 = vmov 0.0  }
  0x8b   : > { %v743_v2 = vld [vmem:[%s592_s30] sm:$0xff]  ;;  %740 = vst.msk [vmem:[#allocation2] sm:$0xff] %vm739_vm0, %v738_v0 }
  0x8c   : > { %742 = vst.msk [vmem:[#allocation3] sm:$0xff] %vm739_vm0, %v741_v1 }
  0x8d   : > { %745 = vst.msk [vmem:[#allocation4] sm:$0xff] %vm744_vm1, %v743_v2 }
  0x8e   : > { %746 = vst.msk [vmem:[#allocation5] sm:$0xff] %vm744_vm1, %v1830_v3 }
  0x8f PF: > { %v784_v4 = vld [vmem:[%s2186_s11 + $0x18] sm:$0xff]  ;;  %v783_v6 = vld [vmem:[%s2186_s11 + $0x10] sm:$0xff]  ;;  %v782_v8 = vld [vmem:[%s2186_s11 + $0x8] sm:$0xff]  ;;  %vm756_vm2 = vcmask 261120   ;;  %s2394_s30 = scalar_lea.vmem [#allocation14], %s2175_s17  ;;  %vm819_vm3 = vcmask 130048  }
  0x90   : > { %v751_v5 = vld [vmem:[%s2179_s18 + $0x18] sm:$0xff]  ;;  %804 = vmatpush.msra.mxu1 %v784_v4  ;;  %v750_v7 = vld [vmem:[%s2179_s18 + $0x10] sm:$0xff]  ;;  %v749_v9 = vld [vmem:[%s2179_s18 + $0x8] sm:$0xff]  ;;  %vm873_vm4 = vcmask 64512   ;;  %s2395_s17 = sld [smem:[#allocation31_spill]] }
  0x91   : > { %772 = vmatpush.msra.mxu0 %v751_v5  ;;  %v781_v10 = vld [vmem:[%s2186_s11] sm:$0xff]  ;;  %v1410_v14 = vld [vmem:[%s733_s1] ss:$0 sm:$0xff] }
  0x92   : > { %805 = vmatpush.msra.mxu1 %v783_v6  ;;  %v748_v11 = vld [vmem:[%s2179_s18] sm:$0xff]  ;;  %v747_v13 = vld [vmem:[#allocation2] sm:$0xff] }
  0x93   : > { %773 = vmatpush.msra.mxu0 %v750_v7  ;;  %v780_v12 = vld [vmem:[#allocation3] sm:$0xff]  ;;  %v1411_v15 = vld [vmem:[%s2394_s30] ss:$0 sm:$0xff] }
  0x94   : > { %806 = vmatpush.msra.mxu1 %v782_v8  ;;  %v814_v21 = vld [vmem:[%s2193_s20 + $0x8] sm:$0xff]  ;;  %v813_v22 = vld [vmem:[%s2193_s20] sm:$0xff] }
  0x95   : > { %774 = vmatpush.msra.mxu0 %v749_v9  ;;  %837 = vmatpush.msra.mxu2 %v814_v21  ;;  %v812_v23 = vld [vmem:[#allocation4] sm:$0xff]  ;;  %v1412_v26 = vld [vmem:[%s640_s12] ss:$0 sm:$0xff]  ;;  %v908_v40 = vld [vmem:[#allocation5] sm:$0xff] }
  0x96   : > { %807 = vmatpush.msra.mxu1 %v781_v10  ;;  %v910_v34 = vld [vmem:[%s2208_s23 + $0x8] sm:$0xff]  ;;  %v909_v35 = vld [vmem:[%s2208_s23] sm:$0xff]  ;;  %p1256_p12 = scmp.ne.s32.totalorder %s2395_s17, 3 }
  0x97   : > { %775 = vmatpush.msra.mxu0 %v748_v11  ;;  %1250 = vmatmul.msk.f32.vlgmr.msra.gmra.mxu1 %vm756_vm2, %v780_v12  ;;  %s2396_s11 = sld [smem:[#allocation47_spill]] (!%p1256_p12) }
  0x98   : > { %1249 = vmatmul.msk.f32.vlgmr.msra.gmra.mxu0 %vm756_vm2, %v747_v13  ;;  %838 = vmatpush.msra.mxu2 %v813_v22 }
  0x99   : > { %1251 = vmatmul.msk.f32.vlgmr.msra.gmra.mxu2 %vm819_vm3, %v812_v23 }
 0x114   : > { %v809_v16 = vpop.f32.mrf.mxu1 }
 0x115   : > { %v777_v17 = vpop.f32.mrf.mxu0  ;;  %v810_v18 = vadd.f32 %v1410_v14, %v809_v16 }
 0x116   : > { %v778_v19 = vadd.f32 %v1411_v15, %v777_v17 }
 0x117   : > { %844 = vst.msk [vmem:[#allocation3] sm:$0xff] %vm756_vm2, %v810_v18  ;;  %1252 = vmatpush.xpose.msk.msra.mxu3 %vm756_vm2, %v810_v18 }
 0x118   : > { %v846_v20 = vmul.f32 0.17677669, %v778_v19  ;;  %843 = vst.msk [vmem:[#allocation2] sm:$0xff] %vm756_vm2, %v778_v19 }
 0x11a   : > { %1253 = vmatmul.msk.f32.vlgmr.msra.gmra.mxu3 %vm756_vm2, %v846_v20 }
 0x11b   : > { %928 = vmatpush.msrb.mxu3 %v910_v34 }
 0x11c   : > { %v840_v27 = vpop.f32.mrf.mxu2 }
 0x11d   : > { %v841_v28 = vadd.f32 %v1412_v26, %v840_v27  ;;  %929 = vmatpush.msrb.mxu3 %v909_v35 }
 0x11f   : > { %845 = vst.msk [vmem:[#allocation4] sm:$0xff] %vm819_vm3, %v841_v28  ;;  %903 = vmatpush.msrb.mxu2 %v841_v28 }
 0x19d   : > { %v870_v24 = vpop.f32.mrf.mxu3 }
 0x19e   : > { %v874_v25 = vsel %vm873_vm4, %v870_v24, -inf }
 0x19f   : > { %875 = vmax.xlane.f32.xlu0 %v874_v25 }
 0x212   : > { %v876_v29 = vpop.xlane.xlu0 %875 }
 0x213   : > { %v877_v30 = vsub.f32 %v870_v24, %v876_v29 }
 0x215   : > { %v878_v31 = vmul.f32 1.442695, %v877_v30 }
 0x217   : > { %1413 = vpow2.f32 %v878_v31 }
 0x21d   : > { %v1414_v32 = vpop.eup %1413 }
 0x21e   : > { %v880_v33 = vsel %vm873_vm4, %v1414_v32, 0.0 }
 0x21f   : > { %881 = vadd.xlane.f32.xlu0 %v880_v33 }
 0x292   : > { %v882_v36 = vpop.xlane.xlu0 %881 }
 0x293   : > { %1415 = vrcp.f32 %v882_v36 }
 0x299   : > { %v1416_v37 = vpop.eup %1415 }
 0x29a   : > { %v884_v38 = vmul.f32 %v1416_v37, %v1414_v32 }
 0x29c   : > { %1254 = vmatmul.msk.f32.vlgmr.msrb.gmra.mxu2 %vm873_vm4, %v884_v38 }
 0x31f   : > { %v905_v39 = vpop.f32.mrf.mxu2 }
 0x320   : > { %1255 = vmatmul.msk.f32.vlgmr.msrb.gmra.mxu3 %vm819_vm3, %v905_v39 }
 0x3a2   : > { %939 = sbr.rel (%p1256_p12) target bundleno = 945 (0x3b1), region = 108 }
 0x3a3   : > { %v931_v41 = vpop.f32.mrf.mxu3 }
 0x3a4   : > { %v934_v42 = vadd.f32 %v931_v41, %v908_v40 }
 0x3a6   : > { %935 = vst.msk [vmem:[#allocation5] sm:$0xff] %vm819_vm3, %v934_v42 }
 0x3a7   : > { %v1417_v44 = vld [vmem:[%s2396_s11] ss:$0 sm:$0xff] }
 0x3ad   : > { %v940_v43 = vld [vmem:[#allocation5] sm:$0xff] }
 0x3ae   : > { %v945_v45 = vadd.f32 %v1417_v44, %v940_v43 }
 0x3b0   : > { %946 = vst.msk [vmem:[%s730_s14] sm:$0xff] %vm819_vm3, %v945_v45 }
 0x3b1 PF: > { %s2397_s13 = sld [smem:[#allocation32_spill]]  ;;  %s960_s3 = sshll.u32 %s730_s14, 4  ;;  %s961_s3 = int_to_ptr.vmem [resolvable:$true] %s960_s3 }
 0x3b2   : > { %s2399_s6 = sld [smem:[#allocation48_spill]]  ;;  %s948_s1 = scalar_lea.sflag [#allocation8], %s2157_s29 }
 0x3b7   : > { %s1258_s16 = sshll.u32 %s2397_s13, 3 }
 0x3b8   : > { %s958_s26 = scalar_lea.hbm %s2399_s6, %s1258_s16  ;;  %s1708_s17 = scalar_lea.hbm %s2399_s6, 16 }
 0x3b9   : > { %s962_s28 = sshll.u32 %s958_s26, 4  ;;  %s963_s28 = int_to_ptr.hbm [resolvable:$true] %s962_s28 }
 0x3ba   : > { %s1702_s24 = sshra.s32 %s963_s28, 4  ;;  %s1703_s24 = int_to_ptr.hbm [resolvable:$true] %s1702_s24 }
 0x3bb   : > { %s1704_s27 = scalar_lea.hbm %s1703_s24, 8  ;;  %p1709_p10 = scmp.lt.s32.totalorder %s1703_s24, %s2399_s6 }
 0x3bc   : > { %p1705_p13 = scmp.ne.s32.totalorder %s1703_s24, %s1704_s27  ;;  %p1710_p1 = scmp.lt.s32.totalorder %s1708_s17, %s1704_s27 }
 0x3be   : > { %p1706_p0 = pnand %p1705_p13, %p2014_p8  ;;  %p1711_p3 = por %p1710_p1, %p1709_p10 }
 0x3c0   : > { %p1707_p5 = pneg %p1706_p0 }
 0x3c2   : > { %p1712_p6 = pnand %p1711_p3, %p1707_p5 }
 0x3c4   : > { %1715 = shalt.err (!%p1712_p6)
}
 0x3c5   : > { %1283 = dma.vmem_to_hbm [thread:$0]  (%p2014_p8), %s961_s3, 128, %s963_s28, %s948_s1  }
 0x3c6 PF: > { %s2400_s29 = sld [smem:[#allocation34_spill]] }
 0x3c7   : > { %s2401_s19 = sld [smem:[#allocation30_spill]] }
 0x3cc   : > { %p1318_p9 = scmp.ge.s32.totalorder %s2400_s29, 2 }
 0x3cd   : > { %s974_s11 = sand.u32 1, %s2401_s19  }
 0x3ce   : > { %p1314_p11 = pnand %p1318_p9, %p2021_p2  ;;  %s975_s13 = scalar_lea.sflag [#allocation8], %s974_s11 }
 0x3d0   : > { %p1315_p4 = pneg %p1314_p11 }
 0x3d2   : > { %1781 = dma.done.wait (%p1315_p4), %s975_s13, 128  }
 0x3d3   : > { %1783 = vsyncadd (%p1315_p4), %s975_s13, 4294967168  ;;  %s39_s27 = sadd.s32 1, %s2400_s29   ;;  %s2403_s17 = sld [smem:[#allocation28_spill]] }
 0x3d4   : > { %p36_p7 = scmp.ge.s32.totalorder %s39_s27, 10   ;;  %s2404_s18 = sld [smem:[#allocation29_spill]] }
 0x3d5   : > { %s2405_s19 = sld [smem:[#allocation39_spill]]  ;;  %s2410_s20 = smov %s1802_s21 }
 0x3d6   : > { %s2406_s16 = sld [smem:[#allocation40_spill]]  ;;  %s2411_s21 = smov %s1806_s22 }
 0x3d7   : > { %s2407_s24 = sld [smem:[#allocation33_spill]]  ;;  %s2413_s23 = smov %s1818_s25 }
 0x3d8   : > { %s2408_s12 = sld [smem:[#allocation36_spill]] }
 0x3d9   : > { %s2409_s26 = sld [smem:[#allocation37_spill]] }
 0x3da   :  { %38 = sbr.rel (!%p36_p7) target bundleno = 23 (0x17), region = 216 }
 0x3dc   : > { %s2412_s22 = smov %s2406_s16 }
 0x3de   : > { %s2414_s25 = smov %s2408_s12 }
 0x3df   :  { %981 = vsyncpa [#allocation7], 1 }
 0x3e0   :  { %983 = vsyncpa [#allocation7 + $0x1], 1 }
 0x3e1   :  { %984 = vsyncpa [#allocation10], 1 }
 0x3e2   :  { %986 = vsyncpa [#allocation10 + $0x1], 1 }
 0x3e3   :  { %987 = vsyncpa [#allocation13], 1 }
 0x3e4   :  { %989 = vsyncpa [#allocation13 + $0x1], 1 }
 0x3e5   :  { %990 = vsyncpa [#allocation16], 1 }
 0x3e6   :  { %992 = vsyncpa [#allocation16 + $0x1], 1 }
 0x3e7   :  { %993 = vsyncpa [#allocation19], 1 }
 0x3e8   :  { %995 = vsyncpa [#allocation19 + $0x1], 1 }
 0x3e9   :  { %996 = vsyncpa [#allocation8], 1 }
 0x3ea   :  { %998 = vsyncpa [#allocation8 + $0x1], 1 }

</bundles_post_ra>
